<compile_context>
chip_gen: v6e
topology: v6e:2x2x1
jax: 0.10.0
libtpu: 0.0.40
codegen_flags: <defaults>
</compile_context>

<pallas_src>
import math

import numpy as np
import jax
import jax.numpy as jnp
from jax.experimental import pallas as pl
from jax.experimental.pallas import tpu as pltpu


def _cdiv(a, b):
    return -(-a // b)


def _round_up(x, m):
    return ((x + m - 1) // m) * m


def _rope_kernel(coef_ref, bias_ref, out_ref):
    # coef_ref: VMEM f32[1, W]  per-lane multiplier = k*scale*inv_freq_full[l % dim]
    # bias_ref: VMEM f32[1, W]  per-lane additive   = (l//dim + offset)*scale*inv_freq_full[l % dim]
    # out_ref : VMEM f32[TS, W] one tile of the lane-widened table
    ts, w = out_ref.shape
    # Global wide-row index of each row in this tile (int math, then one convert).
    rows = (jax.lax.broadcasted_iota(jnp.int32, (ts, w), 0)
            + pl.program_id(0) * ts).astype(jnp.float32)
    # out[r, l] = (r*k + l//dim + offset) * scale * inv_freq_full[l % dim]
    #           = r * coef[l] + bias[l]      -> single full-width unmasked store.
    out_ref[...] = rows * coef_ref[0, :] + bias_ref[0, :]


def _choose_lane_widening(dim):
    # Smallest k making k*dim a multiple of 128, then grow until >= 512 lanes.
    k = 128 // math.gcd(dim, 128)
    while k * dim < 512:
        k *= 2
    return k


def rotary_embedding(max_seq_len, dim, offset=0, seq_len_interpolation_factor=None,
                     tile_bytes=4 << 20):
    """Returns emb of shape [max_seq_len, 1, 1, dim], float32."""
    assert dim % 2 == 0
    scale = (1.0 if seq_len_interpolation_factor is None
             else 1.0 / float(seq_len_interpolation_factor))

    k = _choose_lane_widening(dim)
    W = k * dim                      # lane-dense output width (multiple of 128, >= 512)
    R = _cdiv(max_seq_len, k)        # wide rows (rounded up; excess sliced off below)

    # Per-lane constants with offset / scale / interleave folded in (trace-time).
    inv_freq = 1.0 / (10000.0 ** (np.arange(0, dim, 2, dtype=np.float32) / dim))
    inv_full = np.concatenate([inv_freq, inv_freq]).astype(np.float32)      # [dim]
    inv_lane = np.tile(inv_full, k)                                         # [W]
    q_lane = np.repeat(np.arange(k, dtype=np.float32), dim)                 # [W] = l // dim
    coef = jnp.asarray((k * scale) * inv_lane, dtype=jnp.float32).reshape(1, W)
    bias = jnp.asarray((q_lane + float(offset)) * scale * inv_lane,
                       dtype=jnp.float32).reshape(1, W)

    # Tile rows: target ~tile_bytes per output block, multiple of 8 (8,128 rule),
    # even grid count (when > 1) so v7x's two TCs split the parallel axis evenly.
    rows_per_tile = max(8, (tile_bytes // (W * 4)) // 8 * 8)
    if R <= rows_per_tile:
        TS = R
    else:
        TS = rows_per_tile
        n = _cdiv(R, TS)
        if n % 2 == 1:
            ts2 = max(8, _round_up(_cdiv(R, n + 1), 8))
            if _cdiv(R, ts2) % 2 == 0:
                TS = ts2
    grid = (_cdiv(R, TS),)

    wide = pl.pallas_call(
        _rope_kernel,
        out_shape=jax.ShapeDtypeStruct((R, W), jnp.float32),
        grid=grid,
        in_specs=[
            pl.BlockSpec((1, W), lambda i: (0, 0)),   # coef: DMA'd once, resident
            pl.BlockSpec((1, W), lambda i: (0, 0)),   # bias: DMA'd once, resident
        ],
        out_specs=pl.BlockSpec((TS, W), lambda i: (i, 0)),
        compiler_params=pltpu.CompilerParams(
            dimension_semantics=("parallel",)),       # split seq tiles across TCs (v7x)
        cost_estimate=pl.CostEstimate(
            flops=2 * R * W,
            transcendentals=0,
            bytes_accessed=R * W * 4 + 2 * W * 4),
    )(coef, bias)

    # TODO(synk): if the consumer wants sin/cos tables (or bf16), fuse that
    # transcendental / cast into the store above instead of emitting f32 angles.

    # Row-major reshape (zero-cost) back to per-position layout, drop padding,
    # and add PyTorch's broadcast axes: emb[:, None, None, :].
    emb = wide.reshape(R * k, dim)[:max_seq_len]
    return emb[:, None, None, :]


def _reference(max_seq_len, dim, offset=0, seq_len_interpolation_factor=None):
    inv_freq = 1.0 / (10000.0 ** (jnp.arange(0, dim, 2, dtype=jnp.float32) / dim))
    seq = jnp.arange(max_seq_len, dtype=jnp.float32) + float(offset)
    if seq_len_interpolation_factor is not None:
        seq = seq * (1.0 / seq_len_interpolation_factor)
    freqs = jnp.einsum("i,j->ij", seq, inv_freq)
    emb = jnp.concatenate([freqs, freqs], axis=-1)
    return emb[:, None, None, :]


if __name__ == "__main__":
    # RotaryEmbedding takes no tensor inputs; key created for determinism per spec.
    _ = jax.random.PRNGKey(0)

    def check(max_seq_len, dim, offset, interp, **kw):
        out = jax.block_until_ready(
            rotary_embedding(max_seq_len, dim, offset=offset,
                             seq_len_interpolation_factor=interp, **kw))
        ref = _reference(max_seq_len, dim, offset=offset,
                         seq_len_interpolation_factor=interp)
        assert out.shape == (max_seq_len, 1, 1, dim), out.shape
        np.testing.assert_allclose(np.asarray(out), np.asarray(ref),
                                   rtol=1e-5, atol=1e-6)

    # Small shapes consistent with the module's forward (dim=32, seq=8).
    check(8, 32, offset=2, interp=2.0)
    # No-interpolation path.
    check(8, 32, offset=0, interp=None)
    # Multi-tile path: small tile_bytes forces grid > 1 with a partial last tile
    # (and the even-grid adjustment), exercising the pipelined seq tiling.
    check(1040, 64, offset=1, interp=4.0, tile_bytes=64 * 1024)
    # dim a multiple of 128 with seq not divisible by k (exercises row padding).
    check(301, 128, offset=3, interp=None)

    print("KERNEL_OK")
</pallas_src>

<mosaic_0001>
module attributes {stable_mosaic.version = 11 : i64} {
  func.func @_rope_kernel(%arg0: i32, %arg1: memref<1x512xf32, #tpu.memory_space<vmem>>, %arg2: memref<1x512xf32, #tpu.memory_space<vmem>>, %arg3: memref<1x512xf32, #tpu.memory_space<vmem>>) attributes {dimension_semantics = [#tpu.dimension_semantics<parallel>], iteration_bounds = array<i64: 1>, scalar_prefetch = 0 : i64, scratch_operands = 0 : i64, tpu.core_type = #tpu.core_type<tc>, window_params = [{pipeline_mode = #tpu.pipeline_mode<synchronous>, transform_indices = @transform_0, window_bounds = array<i64: 1, 512>}, {pipeline_mode = #tpu.pipeline_mode<synchronous>, transform_indices = @transform_1, window_bounds = array<i64: 1, 512>}, {transform_indices = @transform_2, window_bounds = array<i64: 1, 512>}]} {
    %0 = tpu.iota {dimensions = array<i32: 0>} : vector<1x512xi32>
    %c1_i32 = arith.constant 1 : i32
    %1 = arith.muli %arg0, %c1_i32 : i32
    %2 = vector.broadcast %1 : i32 to vector<1x512xi32>
    %3 = arith.addi %0, %2 : vector<1x512xi32>
    %4 = arith.sitofp %3 : vector<1x512xi32> to vector<1x512xf32>
    %c0 = arith.constant 0 : index
    %c0_0 = arith.constant 0 : index
    %5 = vector.load %arg1[%c0, %c0_0] : memref<1x512xf32, #tpu.memory_space<vmem>>, vector<1x512xf32>
    %6 = vector.shape_cast %5 : vector<1x512xf32> to vector<512xf32>
    %7 = vector.shape_cast %6 : vector<512xf32> to vector<1x512xf32>
    %8 = arith.mulf %4, %7 : vector<1x512xf32>
    %c0_1 = arith.constant 0 : index
    %c0_2 = arith.constant 0 : index
    %9 = vector.load %arg2[%c0_1, %c0_2] : memref<1x512xf32, #tpu.memory_space<vmem>>, vector<1x512xf32>
    %10 = vector.shape_cast %9 : vector<1x512xf32> to vector<512xf32>
    %11 = vector.shape_cast %10 : vector<512xf32> to vector<1x512xf32>
    %12 = arith.addf %8, %11 : vector<1x512xf32>
    %c0_3 = arith.constant 0 : index
    %c0_4 = arith.constant 0 : index
    %13 = vector.load %arg3[%c0_3, %c0_4] : memref<1x512xf32, #tpu.memory_space<vmem>>, vector<1x512xf32>
    tpu.vector_store %arg3[%c0_3, %c0_4], %12 {strides = array<i32>} : memref<1x512xf32, #tpu.memory_space<vmem>>, vector<1x512xf32>,
    return
  }
  func.func @transform_0(%arg0: i32) -> (i32, i32) {
    %c0_i32 = arith.constant 0 : i32
    %c0_i32_0 = arith.constant 0 : i32
    %c0_i32_1 = arith.constant 0 : i32
    return %c0_i32, %c0_i32_0 : i32, i32
  }
  func.func @transform_1(%arg0: i32) -> (i32, i32) {
    %c0_i32 = arith.constant 0 : i32
    %c0_i32_0 = arith.constant 0 : i32
    %c0_i32_1 = arith.constant 0 : i32
    return %c0_i32, %c0_i32_0 : i32, i32
  }
  func.func @transform_2(%arg0: i32) -> (i32, i32) {
    %c0_i32 = arith.constant 0 : i32
    %c0_i32_0 = arith.constant 0 : i32
    return %arg0, %c0_i32 : i32, i32
  }
}

</mosaic_0001>

<bundles_post_ra>
// kernel: tpu_custom_call.1
= control target key start
LH: loop header
LB: loop body
LE: loop exit
PB: predicated region body
PF: predicated region fallthrough
CT: control target
= control target key end

     0   :  { %7 = vsyncpa [#allocation3], 0  ;;  %s241_s0 = inlined_call_operand.hbm [shape: f32[1,512], index: 0, kind: input, shape index: {}]   ;;  %s242_s1 = inlined_call_operand.hbm [shape: f32[1,512], index: 1, kind: input, shape index: {}]   ;;  %s243_s2 = inlined_call_operand.hbm [shape: f32[1,512], index: 2, kind: output, shape index: {}]  }
   0x1   :  { %8 = vsyncpa [#allocation6], 0 }
   0x2   :  { %9 = vsyncpa [#allocation4], 0  ;;  %s213_s9 = smov [#allocation2]   ;;  %s214_s11 = smov [#allocation5]  }
   0x3   :  { %s16_s10 = sshll.u32 %s213_s9, 4  ;;  %s26_s12 = sshll.u32 %s214_s11, 4  ;;  %s17_s10 = int_to_ptr.vmem [resolvable:$true] %s16_s10  ;;  %s27_s12 = int_to_ptr.vmem [resolvable:$true] %s26_s12 }
   0x4   :  { %s155_s13 = scalar_lea.vmem %s17_s10, 64  ;;  %p160_p1 = scmp.lt.s32.totalorder %s17_s10, %s17_s10 }
   0x5   :  { %p156_p0 = scmp.ne.s32.totalorder %s17_s10, %s155_s13  ;;  %p161_p2 = scmp.lt.s32.totalorder %s155_s13, %s155_s13 }
   0x7   :  { %p162_p3 = por %p161_p2, %p160_p1 }
   0x9   :  { %p163_p4 = pnand %p162_p3, %p156_p0 }
   0xb   :  { %166 = shalt.err (!%p163_p4)
}
   0xc   :  { %19 = dma.hbm_to_vmem [thread:$0]  %s241_s0, 64, %s17_s10, [#allocation3]  }
   0xd   :  { %s175_s16 = scalar_lea.vmem %s27_s12, 64  ;;  %p180_p6 = scmp.lt.s32.totalorder %s27_s12, %s27_s12 }
   0xe   :  { %p176_p5 = scmp.ne.s32.totalorder %s27_s12, %s175_s16  ;;  %p181_p7 = scmp.lt.s32.totalorder %s175_s16, %s175_s16 }
  0x10   :  { %p182_p8 = por %p181_p7, %p180_p6 }
  0x12   :  { %p183_p9 = pnand %p182_p8, %p176_p5 }
  0x14   :  { %186 = shalt.err (!%p183_p9)
}
  0x15   :  { %29 = dma.hbm_to_vmem [thread:$0]  %s242_s1, 64, %s27_s12, [#allocation6]  }
  0x16   :  { %207 = dma.done.wait [#allocation3], 64  }
  0x17   :  { %208 = vsyncadd [#allocation3], 4294967232 }
  0x18   :  { %209 = dma.done.wait [#allocation6], 64  }
  0x19   :  { %210 = vsyncadd [#allocation6], 4294967232  ;;  %v36_v0 = vlaneseq  ;;  %v215_v2 = vmov 1966171168   ;;  %v41_v9 = vld [vmem:[#allocation2] sm:$0xf] }
  0x1a   :  { %v100_v3 = vunpack.c.l.s4 %v215_v2  ;;  %v67_v10 = vld [vmem:[#allocation5] sm:$0xf]  ;;  %s216_s0 = smov [#allocation7]  }
  0x1b   :  { %v37_v1 = vshrl.u32 %v36_v0, 7  ;;  %s133_s1 = sshll.u32 %s216_s0, 4  ;;  %vm124_vm0 = vcmp.lt.s32.totalorder %v36_v0, 512  ;;  %s134_s1 = int_to_ptr.vmem [resolvable:$true] %s133_s1 }
  0x1c   :  { %v101_v11 = vunpack.c.0.s8 %v100_v3  ;;  %s187_s19 = scalar_lea.vmem %s134_s1, 64  ;;  %p192_p11 = scmp.lt.s32.totalorder %s134_s1, %s134_s1 }
  0x1d   :  { %v45_v4 = vsub.s32 0, %v37_v1  ;;  %v49_v5 = vsub.s32 1, %v37_v1  ;;  %v53_v6 = vsub.s32 2, %v37_v1  ;;  %v57_v7 = vsub.s32 3, %v37_v1  ;;  %p188_p10 = scmp.ne.s32.totalorder %s134_s1, %s187_s19  ;;  %p193_p12 = scmp.lt.s32.totalorder %s187_s19, %s187_s19 }
  0x1e   :  { %v40_v8 = vcvt.s32.f32 %v37_v1  ;;  %v104_v24 = vsub.s32 %v101_v11, %v37_v1 }
  0x1f   :  { %v46_v12 = vrot.slane %v41_v9, %v45_v4  ;;  %v50_v13 = vrot.slane %v41_v9, %v49_v5  ;;  %v54_v14 = vrot.slane %v41_v9, %v53_v6  ;;  %v58_v15 = vrot.slane %v41_v9, %v57_v7  ;;  %p194_p13 = por %p193_p12, %p192_p11 }
  0x20   :  { %v72_v16 = vrot.slane %v67_v10, %v45_v4  ;;  %v76_v17 = vrot.slane %v67_v10, %v49_v5  ;;  %v80_v18 = vrot.slane %v67_v10, %v53_v6  ;;  %v84_v19 = vrot.slane %v67_v10, %v57_v7 }
  0x21   :  { %v63_v20 = vmul.f32 %v46_v12, %v40_v8  ;;  %v64_v21 = vmul.f32 %v50_v13, %v40_v8  ;;  %v65_v22 = vmul.f32 %v54_v14, %v40_v8  ;;  %v66_v23 = vmul.f32 %v58_v15, %v40_v8  ;;  %p195_p0 = pnand %p194_p13, %p188_p10 }
  0x23   :  { %v89_v25 = vadd.f32 %v72_v16, %v63_v20  ;;  %v90_v26 = vadd.f32 %v76_v17, %v64_v21  ;;  %v91_v27 = vadd.f32 %v80_v18, %v65_v22  ;;  %v92_v28 = vadd.f32 %v84_v19, %v66_v23 }
  0x25   :  { %v97_v29 = vcombine.low %v89_v25, %v90_v26  ;;  %v98_v30 = vcombine.low %v91_v27, %v92_v28 }
  0x27   :  { %v105_v31 = vrot.slane %v97_v29, %v104_v24  ;;  %v112_v32 = vrot.slane %v98_v30, %v104_v24 }
  0x29   :  { %v113_v33 = vcombine.low %v105_v31, %v112_v32 }
  0x2b   :  { %v120_v34 = vrot.slane %v113_v33, %v104_v24 }
  0x2d   :  { %126 = vst.msk [vmem:[#allocation7] sm:$0xf] %vm124_vm0, %v120_v34 }
  0x2e   :  { %198 = shalt.err (!%p195_p0)
}
  0x2f   :  { %136 = dma.vmem_to_hbm [thread:$0]  %s134_s1, 64, %s243_s2, [#allocation4]  }
  0x30   :  { %211 = dma.done.wait [#allocation4], 64  }
  0x31   :  { %212 = vsyncadd [#allocation4], 4294967232 }
  0x32   :  { %140 = vsyncpa [#allocation3], 1 }
  0x33   :  { %141 = vsyncpa [#allocation6], 1 }
  0x34   :  { %142 = vsyncpa [#allocation4], 1 }

</bundles_post_ra>
